<compile_context>
chip_gen: v7x
topology: tpu7x:2x2x1
jax: 0.10.0
libtpu: 0.0.40
codegen_flags: <defaults>
</compile_context>

<pallas_src>
import functools

import jax
import jax.numpy as jnp
from jax import lax
from jax.experimental import pallas as pl
from jax.experimental.pallas import tpu as pltpu


# ---------------------------------------------------------------------------
# Fast path: table fits in VMEM -> keep it resident across the whole grid and
# gather with a one-hot matmul on the MXU (no per-row DMA descriptors at all).
# ---------------------------------------------------------------------------
def _vmem_gather_kernel(*args, apply_scale):
    if apply_scale:
        idx_ref, scale_ref, w_ref, o_ref = args
    else:
        idx_ref, w_ref, o_ref = args
        scale_ref = None

    tb = idx_ref.shape[0]
    V = w_ref.shape[0]
    idx = idx_ref[...]                                      # (tb, 1) int32
    iota = lax.broadcasted_iota(jnp.int32, (tb, V), 1)
    onehot = (iota == idx).astype(w_ref.dtype)              # exactly one 1 per row
    rows = jnp.dot(onehot, w_ref[...], preferred_element_type=jnp.float32)
    if apply_scale:
        rows = rows * scale_ref[...]                        # (tb, E) * (tb, 1)
    o_ref[...] = rows.astype(o_ref.dtype)


# ---------------------------------------------------------------------------
# General path: table stays in HBM; rows are gathered with manual row DMAs,
# double-buffered across grid steps, single aggregated wait per block.
# ---------------------------------------------------------------------------
def _dma_gather_kernel(ids_ref, *args, tb, apply_scale):
    if apply_scale:
        scale_ref, w_hbm, o_ref, gbuf, sems = args
    else:
        scale_ref = None
        w_hbm, o_ref, gbuf, sems = args

    g = pl.program_id(0)
    nb = pl.num_programs(0)

    def issue_block(blk, slot):
        base = blk * tb

        def issue_row(r, carry):
            tok = ids_ref[base + r]
            pltpu.make_async_copy(w_hbm.at[tok], gbuf.at[slot, r],
                                  sems.at[slot]).start()
            return carry

        if tb <= 128:
            for r in range(tb):              # fully unrolled, static trip count
                issue_row(r, 0)
        else:                                # bounded unroll for big blocks
            lax.fori_loop(0, tb, issue_row, 0, unroll=8)

    # Prime slot 0 on the very first grid step.
    @pl.when(g == 0)
    def _():
        issue_block(0, 0)

    # Prefetch block g+1 into the other slot BEFORE waiting on slot g, so its
    # descriptor issue + gather latency hide under this block's multiply/store.
    # Reading the next block's ids from SMEM here (before .wait()) also keeps
    # sst->sld forwarding intact.
    @pl.when(g + 1 < nb)
    def _():
        issue_block(g + 1, (g + 1) % 2)

    slot = g % 2
    # Single aggregated wait: all tb row copies for this slot signalled the same
    # DMA semaphore (byte-count accounting), so one wait whose descriptor covers
    # the full (tb, E) byte count consumes them all.
    pltpu.make_async_copy(w_hbm.at[pl.ds(0, tb)], gbuf.at[slot],
                          sems.at[slot]).wait()

    rows = gbuf[slot]
    if apply_scale:
        rows = rows.astype(jnp.float32) * scale_ref[...]    # (tb, E) * (tb, 1)
    o_ref[...] = rows.astype(o_ref.dtype)


def fix_mask_embedded_dropout_forward(weight_raw, tokens, mask=None,
                                      dropout=0.5, training=True,
                                      block_tokens=128,
                                      gather_mode="auto",
                                      small_table_bytes=2 * 1024 * 1024,
                                      small_table_max_rows=4096):
    """Forward pass of fixMaskEmbeddedDropout.

    weight_raw: (V, E) float array  (the 'weight_raw' parameter)
    tokens:     (B, T) int array    (embedding indices)
    mask:       (V, 1) 0/1 float array (fixed per-row bernoulli draw);
                required when training=True.
    gather_mode: "auto" | "vmem" (resident-table one-hot) | "dma" (row DMAs).
    """
    V, E = weight_raw.shape
    B, T = tokens.shape
    N = B * T
    itemsize = jnp.dtype(weight_raw.dtype).itemsize

    # Clamp ids: an out-of-range id must never become an out-of-bounds HBM DMA.
    # (Semantic difference vs. PyTorch, which would raise on a bad index.)
    ids = jnp.clip(tokens.reshape(-1).astype(jnp.int32), 0, V - 1)

    apply_scale = bool(training)
    if apply_scale:
        assert mask is not None, "training=True requires the fixed per-row mask"
        # Fold 1/(1-p) into the mask once -> per-ROW scale, shape (V,).
        row_scale = mask.reshape(-1).astype(jnp.float32) / (1.0 - dropout)

    # Sublane-aligned token block: 8 for 4-byte, 16 for 2-byte, 32 for 1-byte
    # weights, so (tb, E) output stores are full-tile (unmasked) vst.
    sub = {4: 8, 2: 16, 1: 32}.get(itemsize, 8)
    tb = max(sub, min(block_tokens, pl.cdiv(N, sub) * sub))
    tb = pl.cdiv(tb, sub) * sub

    # Path selection.
    mode = gather_mode
    if mode == "auto":
        small = (V * E * itemsize <= small_table_bytes
                 and V <= small_table_max_rows)
        mode = "vmem" if small else "dma"
    if mode == "dma" and V < tb:
        # The aggregated-wait descriptor slices rows [0, tb) of the table; keep
        # that slice valid (a table with fewer than tb rows is tiny anyway).
        if V >= sub:
            tb = (V // sub) * sub
        else:
            mode = "vmem"

    n_blocks = pl.cdiv(N, tb)
    n_pad = n_blocks * tb
    ids_p = jnp.pad(ids, (0, n_pad - N))                  # pad with id 0 (in range)
    if apply_scale:
        # Per-token scale (scale of its row): tiny XLA gather, shape (n_pad, 1).
        scale_tok = row_scale[ids_p].reshape(n_pad, 1)

    out_sds = jax.ShapeDtypeStruct((n_pad, E), weight_raw.dtype)

    if mode == "vmem":
        # ----- small-table fast path: resident table + one-hot MXU gather -----
        idx2d = ids_p.reshape(n_pad, 1)
        in_specs = [pl.BlockSpec((tb, 1), lambda g: (g, 0))]
        operands = [idx2d]
        if apply_scale:
            in_specs.append(pl.BlockSpec((tb, 1), lambda g: (g, 0)))
            operands.append(scale_tok)
        # Constant index_map: the table is DMA'd once and stays VMEM-resident.
        in_specs.append(pl.BlockSpec((V, E), lambda g: (0, 0)))
        operands.append(weight_raw)

        vmem_est = V * E * itemsize + 2 * tb * E * itemsize + 8 * tb * 8 + (1 << 20)
        out_flat = pl.pallas_call(
            functools.partial(_vmem_gather_kernel, apply_scale=apply_scale),
            out_shape=out_sds,
            grid=(n_blocks,),
            in_specs=in_specs,
            out_specs=pl.BlockSpec((tb, E), lambda g: (g, 0)),
            compiler_params=pltpu.CompilerParams(
                dimension_semantics=("parallel",),
                vmem_limit_bytes=int(max(32 << 20, vmem_est)),
            ),
        )(*operands)
    else:
        # ----- general path: HBM table, double-buffered manual row gather -----
        in_specs = []
        operands = [ids_p]
        if apply_scale:
            in_specs.append(pl.BlockSpec((tb, 1), lambda g, ids: (g, 0)))
            operands.append(scale_tok)
        in_specs.append(pl.BlockSpec(memory_space=pl.ANY))   # table stays in HBM
        operands.append(weight_raw)

        # Double-buffered gather scratch + double-buffered output block.
        # Keep tb*E*itemsize around <= 4-6 MiB on v7x (64 MiB VMEM / 2 TCs);
        # on v5e/v6e (128 MiB) block_tokens can be raised to 256-512.
        vmem_est = 4 * tb * E * itemsize + 4 * tb * 8 + (2 << 20)
        out_flat = pl.pallas_call(
            functools.partial(_dma_gather_kernel, tb=tb, apply_scale=apply_scale),
            out_shape=out_sds,
            grid_spec=pltpu.PrefetchScalarGridSpec(
                num_scalar_prefetch=1,            # ids -> SMEM, read in-kernel
                grid=(n_blocks,),
                in_specs=in_specs,
                out_specs=pl.BlockSpec((tb, E), lambda g, ids: (g, 0)),
                scratch_shapes=[
                    pltpu.VMEM((2, tb, E), weight_raw.dtype),  # double-buffered gather
                    pltpu.SemaphoreType.DMA((2,)),             # one sem per slot
                ],
            ),
            # "arbitrary": grid steps must run in order (cross-step prefetch).
            # TODO(synk): a CORE_PARALLEL leading axis could split token blocks
            # across v7x's 2 TensorCores, but needs per-core priming logic.
            compiler_params=pltpu.CompilerParams(
                dimension_semantics=("arbitrary",),
                vmem_limit_bytes=int(max(32 << 20, vmem_est)),
            ),
        )(*operands)

    return out_flat[:N].reshape(B, T, E)


if __name__ == "__main__":
    key = jax.random.PRNGKey(0)
    k_w, k_tok, k_mask = jax.random.split(key, 3)

    vocab, emb_dim = 32, 128
    batch, seq = 2, 8
    dropout = 0.5

    # Deterministic stand-ins for nn.Embedding(vocab, emb_dim).weight and inputs.
    weight_raw = jax.random.normal(k_w, (vocab, emb_dim), dtype=jnp.float32)
    tokens = jax.random.randint(k_tok, (batch, seq), 0, vocab, dtype=jnp.int32)

    # Fixed per-row bernoulli mask (drawn once when draw_mask=True, then reused).
    mask = jax.random.bernoulli(k_mask, 1.0 - dropout, (vocab, 1)).astype(jnp.float32)

    # Reference (plain JAX)
    w_masked = weight_raw * mask / (1.0 - dropout)
    ref_train = jnp.take(w_masked, tokens, axis=0)
    ref_eval = jnp.take(weight_raw, tokens, axis=0)

    # --- fast (VMEM-resident / one-hot MXU) path: auto-selected for this table ---
    out_train_v = fix_mask_embedded_dropout_forward(
        weight_raw, tokens, mask=mask, dropout=dropout, training=True)
    out_eval_v = fix_mask_embedded_dropout_forward(
        weight_raw, tokens, training=False)

    # --- forced DMA-gather path with small blocks so the double-buffered
    #     prefetch + aggregated single wait are exercised over 2 grid steps ---
    out_train_d = fix_mask_embedded_dropout_forward(
        weight_raw, tokens, mask=mask, dropout=dropout, training=True,
        gather_mode="dma", block_tokens=8)
    out_eval_d = fix_mask_embedded_dropout_forward(
        weight_raw, tokens, training=False, gather_mode="dma", block_tokens=8)

    out_train_v = jax.block_until_ready(out_train_v)
    out_eval_v = jax.block_until_ready(out_eval_v)
    out_train_d = jax.block_until_ready(out_train_d)
    out_eval_d = jax.block_until_ready(out_eval_d)

    assert out_train_v.shape == (batch, seq, emb_dim)
    assert jnp.allclose(out_train_v, ref_train, atol=1e-5, rtol=1e-5)
    assert jnp.allclose(out_eval_v, ref_eval, atol=1e-5, rtol=1e-5)
    assert jnp.allclose(out_train_d, ref_train, atol=1e-5, rtol=1e-5)
    assert jnp.allclose(out_eval_d, ref_eval, atol=1e-5, rtol=1e-5)

    print("KERNEL_OK")
</pallas_src>

<mosaic_0001>
module attributes {stable_mosaic.version = 11 : i64} {
  func.func @_vmem_gather_kernel(%arg0: i32, %arg1: memref<16x1xi32, #tpu.memory_space<vmem>>, %arg2: memref<16x1xf32, #tpu.memory_space<vmem>>, %arg3: memref<32x128xf32, #tpu.memory_space<vmem>>, %arg4: memref<16x128xf32, #tpu.memory_space<vmem>>) attributes {dimension_semantics = [#tpu.dimension_semantics<parallel>], iteration_bounds = array<i64: 1>, scalar_prefetch = 0 : i64, scratch_operands = 0 : i64, tpu.core_type = #tpu.core_type<tc>, window_params = [{transform_indices = @transform_0, window_bounds = array<i64: 16, 1>}, {transform_indices = @transform_1, window_bounds = array<i64: 16, 1>}, {pipeline_mode = #tpu.pipeline_mode<synchronous>, transform_indices = @transform_2, window_bounds = array<i64: 32, 128>}, {transform_indices = @transform_3, window_bounds = array<i64: 16, 128>}]} {
    %c0 = arith.constant 0 : index
    %c0_0 = arith.constant 0 : index
    %0 = vector.load %arg1[%c0, %c0_0] : memref<16x1xi32, #tpu.memory_space<vmem>>, vector<16x1xi32>
    %1 = tpu.iota {dimensions = array<i32: 1>} : vector<16x32xi32>
    %2 = vector.broadcast %0 : vector<16x1xi32> to vector<16x32xi32>
    %3 = arith.cmpi eq, %1, %2 : vector<16x32xi32>
    %4 = arith.extui %3 : vector<16x32xi1> to vector<16x32xi32>
    %5 = arith.sitofp %4 : vector<16x32xi32> to vector<16x32xf32>
    %c0_1 = arith.constant 0 : index
    %c0_2 = arith.constant 0 : index
    %6 = vector.load %arg3[%c0_1, %c0_2] : memref<32x128xf32, #tpu.memory_space<vmem>>, vector<32x128xf32>
    %cst = arith.constant dense<0.000000e+00> : vector<16x128xf32>
    %7 = tpu.matmul %5, %6, %cst {dimension_numbers = #tpu.dot_dimension_numbers<[1], [0], [0], [1], [0, 0, 1, 1], [], []>} : vector<16x32xf32>, vector<32x128xf32>, vector<16x128xf32> -> vector<16x128xf32>
    %c0_3 = arith.constant 0 : index
    %c0_4 = arith.constant 0 : index
    %8 = vector.load %arg2[%c0_3, %c0_4] : memref<16x1xf32, #tpu.memory_space<vmem>>, vector<16x1xf32>
    %9 = vector.broadcast %8 : vector<16x1xf32> to vector<16x128xf32>
    %10 = arith.mulf %7, %9 : vector<16x128xf32>
    %c0_5 = arith.constant 0 : index
    %c0_6 = arith.constant 0 : index
    %11 = vector.load %arg4[%c0_5, %c0_6] : memref<16x128xf32, #tpu.memory_space<vmem>>, vector<16x128xf32>
    tpu.vector_store %arg4[%c0_5, %c0_6], %10 {strides = array<i32>} : memref<16x128xf32, #tpu.memory_space<vmem>>, vector<16x128xf32>,
    return
  }
  func.func @transform_0(%arg0: i32) -> (i32, i32) {
    %c0_i32 = arith.constant 0 : i32
    %c0_i32_0 = arith.constant 0 : i32
    return %arg0, %c0_i32 : i32, i32
  }
  func.func @transform_1(%arg0: i32) -> (i32, i32) {
    %c0_i32 = arith.constant 0 : i32
    %c0_i32_0 = arith.constant 0 : i32
    return %arg0, %c0_i32 : i32, i32
  }
  func.func @transform_2(%arg0: i32) -> (i32, i32) {
    %c0_i32 = arith.constant 0 : i32
    %c0_i32_0 = arith.constant 0 : i32
    %c0_i32_1 = arith.constant 0 : i32
    return %c0_i32, %c0_i32_0 : i32, i32
  }
  func.func @transform_3(%arg0: i32) -> (i32, i32) {
    %c0_i32 = arith.constant 0 : i32
    %c0_i32_0 = arith.constant 0 : i32
    return %arg0, %c0_i32 : i32, i32
  }
}

</mosaic_0001>

<bundles_post_ra>
// kernel: tpu_custom_call.1
= control target key start
LH: loop header
LB: loop body
LE: loop exit
PB: predicated region body
PF: predicated region fallthrough
CT: control target
= control target key end

     0   :  { %v209_v2 = vmov 0   ;;  %s270_s0 = inlined_call_operand.vmem [shape: s32[16,1], index: 0, kind: input, shape index: {}]   ;;  %s271_s1 = inlined_call_operand.vmem [shape: f32[16,1], index: 1, kind: input, shape index: {}]   ;;  %s272_s2 = inlined_call_operand.vmem [shape: f32[32,128], index: 2, kind: input, shape index: {}]   ;;  %s273_s3 = inlined_call_operand.hbm [shape: f32[16,128], index: 3, kind: output, shape index: {}]  }
   0x1   :  { %v15_v0 = vld [vmem:[%s270_s0] sm:$0xff]  ;;  %183 = vset.pattern.permute.xlu0 %v209_v2  ;;  %v32_v3 = vld [vmem:[%s272_s2 + $0x8] sm:$0xff]  ;;  %v33_v4 = vld [vmem:[%s272_s2 + $0x10] sm:$0xff]  ;;  %184 = vset.pattern.permute.xlu1 %v209_v2 }
   0x2   :  { %v31_v1 = vld [vmem:[%s272_s2] sm:$0xff]  ;;  %v34_v5 = vld [vmem:[%s272_s2 + $0x18] sm:$0xff]  ;;  %20 = vperm.xlu0 %183, %v15_v0  }
   0x3   :  { %v170_v6 = vpack.c.bf16 %v32_v3, %v31_v1  ;;  %v174_v7 = vpack.c.bf16 %v34_v5, %v33_v4 }
   0x4   :  { %8 = vsyncpa [#allocation3], 0  ;;  %v16_v8 = vld [vmem:[%s270_s0 + $0x8] sm:$0xff]  ;;  %v117_v9 = vld [vmem:[%s271_s1] sm:$0xff]  ;;  %v17_v11 = vlaneseq  ;;  %vm35_vm0 = vcmask 261120   ;;  %v210_v14 = vmov 0.0  }
   0x5   :  { %171 = vmatprep.subr.bf16.mxu0 %v170_v6  ;;  %121 = vperm.xlu1 %184, %v117_v9   ;;  %v118_v10 = vld [vmem:[%s271_s1 + $0x8] sm:$0xff]  ;;  %s211_s0 = smov [#allocation2]  }
   0x6   :  { %173 = vmatpush3.bf16.msra.mxu0 %v170_v6  ;;  %23 = vperm.xlu0 %183, %v16_v8   ;;  %v18_v12 = vand.u32 127, %v17_v11  ;;  %s138_s27 = sshll.u32 %s211_s0, 4  ;;  %s139_s27 = int_to_ptr.vmem [resolvable:$true] %s138_s27 }
   0x7   :  { %175 = vmatprep.subr.bf16.mxu0 %v174_v7  ;;  %s185_s1 = scalar_lea.vmem %s139_s27, 256  ;;  %p190_p1 = scmp.lt.s32.totalorder %s139_s27, %s139_s27 }
   0x8   :  { %p186_p0 = scmp.ne.s32.totalorder %s139_s27, %s185_s1  ;;  %p191_p2 = scmp.lt.s32.totalorder %s185_s1, %s185_s1 }
   0x9   :  { %126 = vperm.xlu1 %184, %v118_v10  }
   0xa   :  { %177 = vmatpush3.bf16.msra.mxu0 %v174_v7  ;;  %p192_p3 = por %p191_p2, %p190_p1 }
   0xc   :  { %p193_p4 = pnand %p192_p3, %p186_p0 }
  0x81   :  { %v21_v13 = vpop.permute.xlu0 %20 }
  0x82   :  { %vm25_vm1 = vcmp.eq.s32.totalorder %v18_v12, %v21_v13 }
  0x83   :  { %v149_v15 = vsel %vm25_vm1, 1.0, %v210_v14 }
  0x84   :  { %167 = vmatprep.mubr.msk.f32.mxu0 %vm35_vm0, %v149_v15  ;;  %v122_v18 = vpop.permute.xlu1 %121 }
  0x85   :  { %v24_v16 = vpop.permute.xlu0 %23 }
  0x86   :  { %vm26_vm2 = vcmp.eq.s32.totalorder %v18_v12, %v24_v16 }
  0x87   :  { %v150_v17 = vsel %vm26_vm2, 1.0, %v210_v14 }
  0x88   :  { %168 = vmatmul.mubr.msk.f32.vlgmr.msra.gmra.mrb[0].mxu0 %vm35_vm0, %v150_v17  ;;  %v127_v19 = vpop.permute.xlu1 %126 }
 0x15b   :  { %v169_v20 = vpop.f32.mrb[0].mxu0 }
 0x15c   :  { %v130_v21 = vmul.f32 %v169_v20, %v127_v19  ;;  %v108_v22 = vpop.f32.mrb[1].mxu0 }
 0x15d   :  { %v129_v23 = vmul.f32 %v122_v18, %v108_v22 }
 0x15e   :  { %132 = vst [vmem:[#allocation2 + $0x8] sm:$0xff] %v130_v21 }
 0x15f   :  { %131 = vst [vmem:[#allocation2] sm:$0xff] %v129_v23 }
 0x160   :  { %196 = shalt.err (!%p193_p4)
}
 0x161   :  { %s197_s30 = scalar_lea.hbm %s273_s3, 256 }
 0x162   :  { %p198_p5 = scmp.ne.s32.totalorder %s273_s3, %s197_s30  ;;  %p201_p6 = scmp.lt.u32.totalorder %s197_s30, %s273_s3 }
 0x164   :  { %p203_p7 = pnand %p201_p6, %p198_p5 }
 0x166   :  { %206 = shalt.err (!%p203_p7)
}
 0x167   :  { %s212_s8 = smov 128   ;;  %s213_s9 = smov 8  }
 0x168   :  { %144 = dma.vmem_to_hbm [thread:$0]  %s139_s27, 256, %s273_s3, [#allocation3], %s212_s8, %s212_s8, %s213_s9  }
 0x169   :  { %207 = dma.done.wait [#allocation3], 256  }
 0x16a   :  { %208 = vsyncadd [#allocation3], 4294967040 }
 0x16b   :  { %148 = vsyncpa [#allocation3], 1 }

</bundles_post_ra>
